<compile_context>
chip_gen: v7x
topology: tpu7x:2x2x1
jax: 0.10.0
libtpu: 0.0.40
codegen_flags: <defaults>
</compile_context>

<pallas_src>
import functools

import jax
import jax.numpy as jnp
from jax.experimental import pallas as pl
from jax.experimental.pallas import tpu as pltpu

IN_FEATURES = 3072      # 3 * 32 * 32
NUM_CLASSES = 10
LANE = 128
SUBLANE = 8


# ----------------------------------------------------------------------------
# Fused GEMM + bias Pallas kernel:  out = x @ w + b
# ----------------------------------------------------------------------------
def _linear_kernel(x_ref, w_ref, b_ref, o_ref):
    # (tm, K) @ (K, Npad) on the MXU with f32 accumulation, fused bias add.
    y = jnp.dot(x_ref[...], w_ref[...], preferred_element_type=jnp.float32)
    o_ref[...] = y + b_ref[...]


def linear_pallas(x_flat, w, b):
    """logits = x_flat @ w.T + b

    x_flat : (M, K)    float32
    w      : (Cout, K) float32   (PyTorch nn.Linear layout)
    b      : (Cout,)   float32
    returns: (M, Cout) float32
    """
    M, K = x_flat.shape
    Cout, Kw = w.shape
    assert K == Kw

    # Pad output channels to a lane-dense multiple of 128 and rows to a
    # sublane multiple of 8; zero padding keeps the math exact.
    n_pad = ((Cout + LANE - 1) // LANE) * LANE
    m_pad = ((M + SUBLANE - 1) // SUBLANE) * SUBLANE

    wt = jnp.zeros((K, n_pad), jnp.float32).at[:, :Cout].set(w.T)
    bp = jnp.zeros((1, n_pad), jnp.float32).at[:, :Cout].set(b.reshape(1, -1))
    xp = jnp.zeros((m_pad, K), jnp.float32).at[:M, :].set(x_flat)

    # Biggest M tile that fits comfortably; for batch=2 this is a single step.
    tm = 512 if (m_pad % 512 == 0) else m_pad
    grid = (m_pad // tm,)

    out = pl.pallas_call(
        _linear_kernel,
        out_shape=jax.ShapeDtypeStruct((m_pad, n_pad), jnp.float32),
        grid=grid,
        in_specs=[
            pl.BlockSpec((tm, K), lambda i: (i, 0)),       # activations tile
            pl.BlockSpec((K, n_pad), lambda i: (0, 0)),    # full weight (grid-invariant)
            pl.BlockSpec((1, n_pad), lambda i: (0, 0)),    # bias (grid-invariant)
        ],
        out_specs=pl.BlockSpec((tm, n_pad), lambda i: (i, 0)),
        compiler_params=pltpu.CompilerParams(
            dimension_semantics=("parallel",),
        ),
    )(xp, wt, bp)

    return out[:M, :Cout]


# ----------------------------------------------------------------------------
# SVM forward: Flatten -> Linear(3072, 10)
# ----------------------------------------------------------------------------
def svm_forward(params, x_nchw):
    N = x_nchw.shape[0]
    x_flat = x_nchw.reshape(N, -1)            # nn.Flatten()
    return linear_pallas(x_flat, params["fc_w"], params["fc_b"])


# ----------------------------------------------------------------------------
# Deterministic parameter initialization (mirrors nn.Linear default init)
# ----------------------------------------------------------------------------
def init_svm_params(key, in_features=IN_FEATURES, num_classes=NUM_CLASSES):
    kw, kb = jax.random.split(key)
    bound = 1.0 / (in_features ** 0.5)
    fc_w = jax.random.uniform(kw, (num_classes, in_features), jnp.float32,
                              minval=-bound, maxval=bound)
    fc_b = jax.random.uniform(kb, (num_classes,), jnp.float32,
                              minval=-bound, maxval=bound)
    return {"fc_w": fc_w, "fc_b": fc_b}


# ----------------------------------------------------------------------------
if __name__ == "__main__":
    key = jax.random.PRNGKey(0)
    pkey, xkey = jax.random.split(key)
    params = init_svm_params(pkey)

    # Input consistent with Linear(3072, 10): NCHW CIFAR-style image, 3x32x32.
    x = jax.random.normal(xkey, (2, 3, 32, 32), jnp.float32)

    fwd = jax.jit(functools.partial(svm_forward, params))
    logits = fwd(x)
    jax.block_until_ready(logits)

    # Reference check against plain XLA.
    ref = x.reshape(2, -1) @ params["fc_w"].T + params["fc_b"]
    assert logits.shape == (2, NUM_CLASSES), logits.shape
    assert bool(jnp.all(jnp.isfinite(logits)))
    assert bool(jnp.max(jnp.abs(logits - ref)) < 1e-3), "mismatch vs reference"
    print("KERNEL_OK")
</pallas_src>

<mosaic_0001>
module attributes {stable_mosaic.version = 11 : i64} {
  func.func @_linear_kernel(%arg0: i32, %arg1: memref<8x3072xf32, #tpu.memory_space<vmem>>, %arg2: memref<3072x128xf32, #tpu.memory_space<vmem>>, %arg3: memref<1x128xf32, #tpu.memory_space<vmem>>, %arg4: memref<8x128xf32, #tpu.memory_space<vmem>>) attributes {dimension_semantics = [#tpu.dimension_semantics<parallel>], iteration_bounds = array<i64: 1>, scalar_prefetch = 0 : i64, scratch_operands = 0 : i64, tpu.core_type = #tpu.core_type<tc>, window_params = [{transform_indices = @transform_0, window_bounds = array<i64: 8, 3072>}, {pipeline_mode = #tpu.pipeline_mode<synchronous>, transform_indices = @transform_1, window_bounds = array<i64: 3072, 128>}, {pipeline_mode = #tpu.pipeline_mode<synchronous>, transform_indices = @transform_2, window_bounds = array<i64: 1, 128>}, {transform_indices = @transform_3, window_bounds = array<i64: 8, 128>}]} {
    %c0 = arith.constant 0 : index
    %c0_0 = arith.constant 0 : index
    %0 = vector.load %arg1[%c0, %c0_0] : memref<8x3072xf32, #tpu.memory_space<vmem>>, vector<8x3072xf32>
    %c0_1 = arith.constant 0 : index
    %c0_2 = arith.constant 0 : index
    %1 = vector.load %arg2[%c0_1, %c0_2] : memref<3072x128xf32, #tpu.memory_space<vmem>>, vector<3072x128xf32>
    %cst = arith.constant dense<0.000000e+00> : vector<8x128xf32>
    %2 = tpu.matmul %0, %1, %cst {dimension_numbers = #tpu.dot_dimension_numbers<[1], [0], [0], [1], [0, 0, 1, 1], [], []>} : vector<8x3072xf32>, vector<3072x128xf32>, vector<8x128xf32> -> vector<8x128xf32>
    %c0_3 = arith.constant 0 : index
    %c0_4 = arith.constant 0 : index
    %3 = vector.load %arg3[%c0_3, %c0_4] : memref<1x128xf32, #tpu.memory_space<vmem>>, vector<1x128xf32>
    %4 = vector.broadcast %3 : vector<1x128xf32> to vector<8x128xf32>
    %5 = arith.addf %2, %4 : vector<8x128xf32>
    %c0_5 = arith.constant 0 : index
    %c0_6 = arith.constant 0 : index
    %6 = vector.load %arg4[%c0_5, %c0_6] : memref<8x128xf32, #tpu.memory_space<vmem>>, vector<8x128xf32>
    tpu.vector_store %arg4[%c0_5, %c0_6], %5 {strides = array<i32>} : memref<8x128xf32, #tpu.memory_space<vmem>>, vector<8x128xf32>,
    return
  }
  func.func @transform_0(%arg0: i32) -> (i32, i32) {
    %c0_i32 = arith.constant 0 : i32
    %c0_i32_0 = arith.constant 0 : i32
    return %arg0, %c0_i32 : i32, i32
  }
  func.func @transform_1(%arg0: i32) -> (i32, i32) {
    %c0_i32 = arith.constant 0 : i32
    %c0_i32_0 = arith.constant 0 : i32
    %c0_i32_1 = arith.constant 0 : i32
    return %c0_i32, %c0_i32_0 : i32, i32
  }
  func.func @transform_2(%arg0: i32) -> (i32, i32) {
    %c0_i32 = arith.constant 0 : i32
    %c0_i32_0 = arith.constant 0 : i32
    %c0_i32_1 = arith.constant 0 : i32
    return %c0_i32, %c0_i32_0 : i32, i32
  }
  func.func @transform_3(%arg0: i32) -> (i32, i32) {
    %c0_i32 = arith.constant 0 : i32
    %c0_i32_0 = arith.constant 0 : i32
    return %arg0, %c0_i32 : i32, i32
  }
}

</mosaic_0001>

<bundles_post_ra>
// kernel: svm_forward.1
= control target key start
LH: loop header
LB: loop body
LE: loop exit
PB: predicated region body
PF: predicated region fallthrough
CT: control target
= control target key end

     0   :  { %s3329_s1 = inlined_call_operand.vmem [shape: f32[3072,128], index: 1, kind: input, shape index: {}]   ;;  %s3330_s0 = inlined_call_operand.vmem [shape: f32[8,3072], index: 0, kind: input, shape index: {}]   ;;  %s3331_s2 = inlined_call_operand.vmem [shape: f32[1,128], index: 2, kind: input, shape index: {}]   ;;  %s3332_s3 = inlined_call_operand.vmem [shape: f32[8,128], index: 3, kind: output, shape index: {}]  }
   0x1   :  { %v54_v0 = vld [vmem:[%s3329_s1 + $0x80] sm:$0xff]  ;;  %v55_v1 = vld [vmem:[%s3329_s1 + $0x88] sm:$0xff]  ;;  %v56_v11 = vld [vmem:[%s3329_s1 + $0x90] sm:$0xff] }
   0x2   :  { %v38_v2 = vld [vmem:[%s3329_s1] sm:$0xff]  ;;  %v1695_v3 = vpack.c.bf16 %v55_v1, %v54_v0  ;;  %v39_v4 = vld [vmem:[%s3329_s1 + $0x8] sm:$0xff]  ;;  %v57_v13 = vld [vmem:[%s3329_s1 + $0x98] sm:$0xff] }
   0x3   :  { %v86_v5 = vld [vmem:[%s3329_s1 + $0x180] sm:$0xff]  ;;  %v87_v6 = vld [vmem:[%s3329_s1 + $0x188] sm:$0xff]  ;;  %v1697_v7 = vpack.c.bf16 %v39_v4, %v38_v2  ;;  %v40_v14 = vld [vmem:[%s3329_s1 + $0x10] sm:$0xff]  ;;  %v1699_v16 = vpack.c.bf16 %v57_v13, %v56_v11 }
   0x4   :  { %v1727_v8 = vpack.c.bf16 %v87_v6, %v86_v5  ;;  %v70_v9 = vld [vmem:[%s3329_s1 + $0x100] sm:$0xff]  ;;  %v71_v10 = vld [vmem:[%s3329_s1 + $0x108] sm:$0xff]  ;;  %1696 = vmatprep.subr.bf16.mxu0 %v1695_v3  ;;  %v41_v15 = vld [vmem:[%s3329_s1 + $0x18] sm:$0xff] }
   0x5   :  { %v1729_v12 = vpack.c.bf16 %v71_v10, %v70_v9  ;;  %1698 = vmatpush3.bf16.msra.mxu0 %v1697_v7  ;;  %v1701_v17 = vpack.c.bf16 %v41_v15, %v40_v14  ;;  %v88_v18 = vld [vmem:[%s3329_s1 + $0x190] sm:$0xff]  ;;  %v89_v19 = vld [vmem:[%s3329_s1 + $0x198] sm:$0xff]  ;;  %v58_v23 = vld [vmem:[%s3329_s1 + $0xa0] sm:$0xff] }
   0x6   :  { %1728 = vmatprep.subr.bf16.mxu1 %v1727_v8  ;;  %v72_v20 = vld [vmem:[%s3329_s1 + $0x110] sm:$0xff]  ;;  %v1731_v21 = vpack.c.bf16 %v89_v19, %v88_v18  ;;  %v73_v22 = vld [vmem:[%s3329_s1 + $0x118] sm:$0xff]  ;;  %v59_v24 = vld [vmem:[%s3329_s1 + $0xa8] sm:$0xff]  ;;  %1700 = vmatprep.subr.bf16.mxu0 %v1699_v16 }
   0x7   :  { %1730 = vmatpush3.bf16.msra.mxu1 %v1729_v12  ;;  %v1733_v25 = vpack.c.bf16 %v73_v22, %v72_v20  ;;  %v1703_v26 = vpack.c.bf16 %v59_v24, %v58_v23  ;;  %v42_v27 = vld [vmem:[%s3329_s1 + $0x20] sm:$0xff]  ;;  %v43_v28 = vld [vmem:[%s3329_s1 + $0x28] sm:$0xff]  ;;  %v60_v35 = vld [vmem:[%s3329_s1 + $0xb0] sm:$0xff] }
   0x8   :  { %v90_v29 = vld [vmem:[%s3329_s1 + $0x1a0] sm:$0xff]  ;;  %1732 = vmatprep.subr.bf16.mxu1 %v1731_v21  ;;  %v91_v30 = vld [vmem:[%s3329_s1 + $0x1a8] sm:$0xff]  ;;  %v1705_v33 = vpack.c.bf16 %v43_v28, %v42_v27  ;;  %v61_v36 = vld [vmem:[%s3329_s1 + $0xb8] sm:$0xff] }
   0x9   :  { %v74_v31 = vld [vmem:[%s3329_s1 + $0x120] sm:$0xff]  ;;  %v75_v32 = vld [vmem:[%s3329_s1 + $0x128] sm:$0xff]  ;;  %1702 = vmatpush3.bf16.msra.mxu0 %v1701_v17  ;;  %v1735_v34 = vpack.c.bf16 %v91_v30, %v90_v29  ;;  %v44_v37 = vld [vmem:[%s3329_s1 + $0x30] sm:$0xff]  ;;  %v1707_v39 = vpack.c.bf16 %v61_v36, %v60_v35 }
   0xa   :  { %1704 = vmatprep.subr.bf16.mxu0 %v1703_v26  ;;  %v1737_v38 = vpack.c.bf16 %v75_v32, %v74_v31  ;;  %v45_v40 = vld [vmem:[%s3329_s1 + $0x38] sm:$0xff]  ;;  %v92_v41 = vld [vmem:[%s3329_s1 + $0x1b0] sm:$0xff]  ;;  %v62_v46 = vld [vmem:[%s3329_s1 + $0xc0] sm:$0xff] }
   0xb   :  { %1734 = vmatpush3.bf16.msra.mxu1 %v1733_v25  ;;  %v93_v42 = vld [vmem:[%s3329_s1 + $0x1b8] sm:$0xff]  ;;  %v76_v44 = vld [vmem:[%s3329_s1 + $0x130] sm:$0xff]  ;;  %v63_v47 = vld [vmem:[%s3329_s1 + $0xc8] sm:$0xff]  ;;  %v1709_v48 = vpack.c.bf16 %v45_v40, %v44_v37 }
   0xc   :  { %1736 = vmatprep.subr.bf16.mxu1 %v1735_v34  ;;  %v1739_v43 = vpack.c.bf16 %v93_v42, %v92_v41  ;;  %v77_v45 = vld [vmem:[%s3329_s1 + $0x138] sm:$0xff]  ;;  %v94_v49 = vld [vmem:[%s3329_s1 + $0x1c0] sm:$0xff]  ;;  %v95_v50 = vld [vmem:[%s3329_s1 + $0x1c8] sm:$0xff]  ;;  %v1711_v52 = vpack.c.bf16 %v63_v47, %v62_v46 }
   0xd   :  { %1706 = vmatpush3.bf16.msra.mxu0 %v1705_v33  ;;  %v1741_v51 = vpack.c.bf16 %v77_v45, %v76_v44  ;;  %v46_v53 = vld [vmem:[%s3329_s1 + $0x40] sm:$0xff]  ;;  %v47_v54 = vld [vmem:[%s3329_s1 + $0x48] sm:$0xff]  ;;  %v1743_v56 = vpack.c.bf16 %v95_v50, %v94_v49  ;;  %v64_v58 = vld [vmem:[%s3329_s1 + $0xd0] sm:$0xff] }
   0xe   :  { %1708 = vmatprep.subr.bf16.mxu0 %v1707_v39  ;;  %v78_v55 = vld [vmem:[%s3329_s1 + $0x140] sm:$0xff]  ;;  %v79_v57 = vld [vmem:[%s3329_s1 + $0x148] sm:$0xff]  ;;  %v65_v59 = vld [vmem:[%s3329_s1 + $0xd8] sm:$0xff]  ;;  %v1713_v62 = vpack.c.bf16 %v47_v54, %v46_v53 }
   0xf   :  { %1738 = vmatpush3.bf16.msra.mxu1 %v1737_v38  ;;  %v96_v60 = vld [vmem:[%s3329_s1 + $0x1d0] sm:$0xff]  ;;  %v97_v61 = vld [vmem:[%s3329_s1 + $0x1d8] sm:$0xff]  ;;  %v1745_v63 = vpack.c.bf16 %v79_v57, %v78_v55  ;;  %v1715_v0 = vpack.c.bf16 %v65_v59, %v64_v58  ;;  %v66_v6 = vld [vmem:[%s3329_s1 + $0xe0] sm:$0xff] }
  0x10   :  { %1740 = vmatprep.subr.bf16.mxu1 %v1739_v43  ;;  %v48_v1 = vld [vmem:[%s3329_s1 + $0x50] sm:$0xff]  ;;  %v49_v2 = vld [vmem:[%s3329_s1 + $0x58] sm:$0xff]  ;;  %v1747_v4 = vpack.c.bf16 %v97_v61, %v96_v60  ;;  %v67_v7 = vld [vmem:[%s3329_s1 + $0xe8] sm:$0xff] }
  0x11   :  { %1710 = vmatpush3.bf16.msra.mxu0 %v1709_v48  ;;  %v80_v3 = vld [vmem:[%s3329_s1 + $0x150] sm:$0xff]  ;;  %v81_v5 = vld [vmem:[%s3329_s1 + $0x158] sm:$0xff]  ;;  %v98_v8 = vld [vmem:[%s3329_s1 + $0x1e0] sm:$0xff]  ;;  %v1717_v10 = vpack.c.bf16 %v49_v2, %v48_v1  ;;  %v1719_v14 = vpack.c.bf16 %v67_v7, %v66_v6 }
  0x12   :  { %1712 = vmatprep.subr.bf16.mxu0 %v1711_v52  ;;  %v99_v9 = vld [vmem:[%s3329_s1 + $0x1e8] sm:$0xff]  ;;  %v50_v11 = vld [vmem:[%s3329_s1 + $0x60] sm:$0xff]  ;;  %v1749_v13 = vpack.c.bf16 %v81_v5, %v80_v3  ;;  %v68_v19 = vld [vmem:[%s3329_s1 + $0xf0] sm:$0xff] }
  0x13   :  { %1742 = vmatpush3.bf16.msra.mxu1 %v1741_v51  ;;  %v51_v12 = vld [vmem:[%s3329_s1 + $0x68] sm:$0xff]  ;;  %v82_v15 = vld [vmem:[%s3329_s1 + $0x160] sm:$0xff]  ;;  %v1751_v18 = vpack.c.bf16 %v99_v9, %v98_v8  ;;  %v69_v20 = vld [vmem:[%s3329_s1 + $0xf8] sm:$0xff] }
  0x14   :  { %1744 = vmatprep.subr.bf16.mxu1 %v1743_v56  ;;  %v83_v16 = vld [vmem:[%s3329_s1 + $0x168] sm:$0xff]  ;;  %v17_v21 = vld [vmem:[%s3330_s0 + $0x18] sm:$0xff]  ;;  %v100_v22 = vld [vmem:[%s3329_s1 + $0x1f0] sm:$0xff]  ;;  %v1721_v24 = vpack.c.bf16 %v51_v12, %v50_v11  ;;  %v1723_v26 = vpack.c.bf16 %v69_v20, %v68_v19 }
  0x15   :  { %1714 = vmatpush3.bf16.msra.mxu0 %v1713_v62  ;;  %v15_v17 = vld [vmem:[%s3330_s0 + $0x8] sm:$0xff]  ;;  %v101_v23 = vld [vmem:[%s3329_s1 + $0x1f8] sm:$0xff]  ;;  %563 = vmatprep.mubr.f32.mxu1 %v17_v21  ;;  %v1753_v25 = vpack.c.bf16 %v83_v16, %v82_v15  ;;  %v52_v27 = vld [vmem:[%s3329_s1 + $0x70] sm:$0xff] }
  0x16   :  { %1716 = vmatprep.subr.bf16.mxu0 %v1715_v0  ;;  %493 = vmatprep.mubr.f32.mxu0 %v15_v17  ;;  %v53_v28 = vld [vmem:[%s3329_s1 + $0x78] sm:$0xff]  ;;  %v84_v29 = vld [vmem:[%s3329_s1 + $0x170] sm:$0xff]  ;;  %v1755_v30 = vpack.c.bf16 %v101_v23, %v100_v22  ;;  %v118_v32 = vld [vmem:[%s3329_s1 + $0x280] sm:$0xff] }
  0x17   :  { %1746 = vmatpush3.bf16.msra.mxu1 %v1745_v63  ;;  %v85_v31 = vld [vmem:[%s3329_s1 + $0x178] sm:$0xff]  ;;  %v119_v33 = vld [vmem:[%s3329_s1 + $0x288] sm:$0xff]  ;;  %v150_v34 = vld [vmem:[%s3329_s1 + $0x380] sm:$0xff]  ;;  %v1725_v36 = vpack.c.bf16 %v53_v28, %v52_v27 }
  0x18   :  { %1748 = vmatprep.subr.bf16.mxu1 %v1747_v4  ;;  %v151_v35 = vld [vmem:[%s3329_s1 + $0x388] sm:$0xff]  ;;  %v1757_v37 = vpack.c.bf16 %v85_v31, %v84_v29  ;;  %v1759_v38 = vpack.c.bf16 %v119_v33, %v118_v32  ;;  %v102_v39 = vld [vmem:[%s3329_s1 + $0x200] sm:$0xff]  ;;  %v120_v44 = vld [vmem:[%s3329_s1 + $0x290] sm:$0xff] }
  0x19   :  { %1718 = vmatpush3.bf16.msra.mxu0 %v1717_v10  ;;  %v103_v40 = vld [vmem:[%s3329_s1 + $0x208] sm:$0xff]  ;;  %v134_v41 = vld [vmem:[%s3329_s1 + $0x300] sm:$0xff]  ;;  %v1791_v42 = vpack.c.bf16 %v151_v35, %v150_v34  ;;  %v121_v45 = vld [vmem:[%s3329_s1 + $0x298] sm:$0xff] }
  0x1a   :  { %1720 = vmatprep.subr.bf16.mxu0 %v1719_v14  ;;  %v135_v43 = vld [vmem:[%s3329_s1 + $0x308] sm:$0xff]  ;;  %v152_v46 = vld [vmem:[%s3329_s1 + $0x390] sm:$0xff]  ;;  %v153_v47 = vld [vmem:[%s3329_s1 + $0x398] sm:$0xff]  ;;  %v1761_v49 = vpack.c.bf16 %v103_v40, %v102_v39  ;;  %v1763_v52 = vpack.c.bf16 %v121_v45, %v120_v44 }
  0x1b   :  { %1750 = vmatpush3.bf16.msra.mxu1 %v1749_v13  ;;  %v14_v48 = vld [vmem:[%s3330_s0] sm:$0xff]  ;;  %v16_v50 = vld [vmem:[%s3330_s0 + $0x10] sm:$0xff]  ;;  %v1793_v51 = vpack.c.bf16 %v135_v43, %v134_v41  ;;  %v105_v54 = vld [vmem:[%s3329_s1 + $0x218] sm:$0xff]  ;;  %v1795_v56 = vpack.c.bf16 %v153_v47, %v152_v46 }
  0x1c   :  { %1752 = vmatprep.subr.bf16.mxu1 %v1751_v18  ;;  %v104_v53 = vld [vmem:[%s3329_s1 + $0x210] sm:$0xff]  ;;  %v137_v57 = vld [vmem:[%s3329_s1 + $0x318] sm:$0xff]  ;;  %v122_v58 = vld [vmem:[%s3329_s1 + $0x2a0] sm:$0xff] }
  0x1d   :  { %1722 = vmatpush3.bf16.msra.mxu0 %v1721_v24  ;;  %v136_v55 = vld [vmem:[%s3329_s1 + $0x310] sm:$0xff]  ;;  %v123_v59 = vld [vmem:[%s3329_s1 + $0x2a8] sm:$0xff]  ;;  %v154_v60 = vld [vmem:[%s3329_s1 + $0x3a0] sm:$0xff]  ;;  %v1765_v62 = vpack.c.bf16 %v105_v54, %v104_v53 }
  0x1e   :  { %1724 = vmatprep.subr.bf16.mxu0 %v1723_v26  ;;  %v155_v61 = vld [vmem:[%s3329_s1 + $0x3a8] sm:$0xff]  ;;  %v1797_v63 = vpack.c.bf16 %v137_v57, %v136_v55  ;;  %v1767_v0 = vpack.c.bf16 %v123_v59, %v122_v58  ;;  %v106_v1 = vld [vmem:[%s3329_s1 + $0x220] sm:$0xff]  ;;  %v124_v6 = vld [vmem:[%s3329_s1 + $0x2b0] sm:$0xff] }
  0x1f   :  { %1754 = vmatpush3.bf16.msra.mxu1 %v1753_v25  ;;  %v107_v2 = vld [vmem:[%s3329_s1 + $0x228] sm:$0xff]  ;;  %v138_v3 = vld [vmem:[%s3329_s1 + $0x320] sm:$0xff]  ;;  %v1799_v4 = vpack.c.bf16 %v155_v61, %v154_v60  ;;  %v125_v7 = vld [vmem:[%s3329_s1 + $0x2b8] sm:$0xff] }
  0x20   :  { %1756 = vmatprep.subr.bf16.mxu1 %v1755_v30  ;;  %v139_v5 = vld [vmem:[%s3329_s1 + $0x328] sm:$0xff]  ;;  %v156_v8 = vld [vmem:[%s3329_s1 + $0x3b0] sm:$0xff]  ;;  %v157_v9 = vld [vmem:[%s3329_s1 + $0x3b8] sm:$0xff]  ;;  %v1769_v10 = vpack.c.bf16 %v107_v2, %v106_v1  ;;  %v1771_v12 = vpack.c.bf16 %v125_v7, %v124_v6 }
  0x21   :  { %1726 = vmatpush3.bf16.msra.mxu0 %v1725_v36  ;;  %v1801_v11 = vpack.c.bf16 %v139_v5, %v138_v3  ;;  %v108_v13 = vld [vmem:[%s3329_s1 + $0x230] sm:$0xff]  ;;  %v109_v14 = vld [vmem:[%s3329_s1 + $0x238] sm:$0xff]  ;;  %v1803_v16 = vpack.c.bf16 %v157_v9, %v156_v8  ;;  %v126_v18 = vld [vmem:[%s3329_s1 + $0x2c0] sm:$0xff] }
  0x22   :  { %1760 = vmatprep.subr.bf16.mxu0 %v1759_v38  ;;  %v140_v15 = vld [vmem:[%s3329_s1 + $0x330] sm:$0xff]  ;;  %v141_v17 = vld [vmem:[%s3329_s1 + $0x338] sm:$0xff]  ;;  %v127_v19 = vld [vmem:[%s3329_s1 + $0x2c8] sm:$0xff]  ;;  %v1773_v22 = vpack.c.bf16 %v109_v14, %v108_v13 }
  0x23   :  { %1758 = vmatpush3.bf16.msra.mxu1 %v1757_v37  ;;  %v158_v20 = vld [vmem:[%s3329_s1 + $0x3c0] sm:$0xff]  ;;  %v159_v21 = vld [vmem:[%s3329_s1 + $0x3c8] sm:$0xff]  ;;  %v1805_v25 = vpack.c.bf16 %v141_v17, %v140_v15  ;;  %v1775_v26 = vpack.c.bf16 %v127_v19, %v126_v18  ;;  %v21_v29 = vld [vmem:[%s3330_s0 + $0x38] sm:$0xff] }
  0x24   :  { %1792 = vmatprep.subr.bf16.mxu1 %v1791_v42  ;;  %494 = vmatmul.mubr.f32.vlgmr.msra.gmra.mrb[0].mxu0 %v14_v48  ;;  %v110_v23 = vld [vmem:[%s3329_s1 + $0x240] sm:$0xff]  ;;  %v19_v24 = vld [vmem:[%s3330_s0 + $0x28] sm:$0xff]  ;;  %v1807_v30 = vpack.c.bf16 %v159_v21, %v158_v20  ;;  %v128_v32 = vld [vmem:[%s3329_s1 + $0x2d0] sm:$0xff] }
  0x25   :  { %1762 = vmatpush3.bf16.msra.mxu0 %v1761_v49  ;;  %v111_v27 = vld [vmem:[%s3329_s1 + $0x248] sm:$0xff]  ;;  %v142_v28 = vld [vmem:[%s3329_s1 + $0x340] sm:$0xff]  ;;  %v129_v33 = vld [vmem:[%s3329_s1 + $0x2d8] sm:$0xff]  ;;  %633 = vmatprep.mubr.f32.mxu0 %v19_v24 }
  0x26   :  { %564 = vmatmul.mubr.f32.vlgmr.msra.gmra.mrb[0].mxu1 %v16_v50  ;;  %1764 = vmatprep.subr.bf16.mxu0 %v1763_v52  ;;  %v143_v31 = vld [vmem:[%s3329_s1 + $0x348] sm:$0xff]  ;;  %v160_v34 = vld [vmem:[%s3329_s1 + $0x3d0] sm:$0xff]  ;;  %v161_v35 = vld [vmem:[%s3329_s1 + $0x3d8] sm:$0xff]  ;;  %v1777_v36 = vpack.c.bf16 %v111_v27, %v110_v23  ;;  %v1779_v38 = vpack.c.bf16 %v129_v33, %v128_v32 }
  0x27   :  { %1794 = vmatpush3.bf16.msra.mxu1 %v1793_v51  ;;  %703 = vmatprep.mubr.f32.mxu1 %v21_v29  ;;  %v1809_v37 = vpack.c.bf16 %v143_v31, %v142_v28  ;;  %v112_v39 = vld [vmem:[%s3329_s1 + $0x250] sm:$0xff]  ;;  %v113_v40 = vld [vmem:[%s3329_s1 + $0x258] sm:$0xff]  ;;  %v1811_v42 = vpack.c.bf16 %v161_v35, %v160_v34  ;;  %v130_v44 = vld [vmem:[%s3329_s1 + $0x2e0] sm:$0xff] }
  0x28   :  { %1796 = vmatprep.subr.bf16.mxu1 %v1795_v56  ;;  %v144_v41 = vld [vmem:[%s3329_s1 + $0x350] sm:$0xff]  ;;  %v145_v43 = vld [vmem:[%s3329_s1 + $0x358] sm:$0xff]  ;;  %v131_v45 = vld [vmem:[%s3329_s1 + $0x2e8] sm:$0xff]  ;;  %v1781_v48 = vpack.c.bf16 %v113_v40, %v112_v39 }
  0x29   :  { %1766 = vmatpush3.bf16.msra.mxu0 %v1765_v62  ;;  %v162_v46 = vld [vmem:[%s3329_s1 + $0x3e0] sm:$0xff]  ;;  %v163_v47 = vld [vmem:[%s3329_s1 + $0x3e8] sm:$0xff]  ;;  %v1813_v49 = vpack.c.bf16 %v145_v43, %v144_v41  ;;  %v1783_v50 = vpack.c.bf16 %v131_v45, %v130_v44  ;;  %v132_v56 = vld [vmem:[%s3329_s1 + $0x2f0] sm:$0xff] }
  0x2a   :  { %1768 = vmatprep.subr.bf16.mxu0 %v1767_v0  ;;  %v114_v51 = vld [vmem:[%s3329_s1 + $0x260] sm:$0xff]  ;;  %v115_v52 = vld [vmem:[%s3329_s1 + $0x268] sm:$0xff]  ;;  %v1815_v54 = vpack.c.bf16 %v163_v47, %v162_v46  ;;  %v133_v57 = vld [vmem:[%s3329_s1 + $0x2f8] sm:$0xff] }
  0x2b   :  { %1798 = vmatpush3.bf16.msra.mxu1 %v1797_v63  ;;  %v146_v53 = vld [vmem:[%s3329_s1 + $0x360] sm:$0xff]  ;;  %v147_v55 = vld [vmem:[%s3329_s1 + $0x368] sm:$0xff]  ;;  %v164_v58 = vld [vmem:[%s3329_s1 + $0x3f0] sm:$0xff]  ;;  %v1785_v60 = vpack.c.bf16 %v115_v52, %v114_v51  ;;  %v1787_v62 = vpack.c.bf16 %v133_v57, %v132_v56 }
  0x2c   :  { %1800 = vmatprep.subr.bf16.mxu1 %v1799_v4  ;;  %v165_v59 = vld [vmem:[%s3329_s1 + $0x3f8] sm:$0xff]  ;;  %v1817_v61 = vpack.c.bf16 %v147_v55, %v146_v53  ;;  %v116_v63 = vld [vmem:[%s3329_s1 + $0x270] sm:$0xff]  ;;  %v182_v4 = vld [vmem:[%s3329_s1 + $0x480] sm:$0xff] }
  0x2d   :  { %1770 = vmatpush3.bf16.msra.mxu0 %v1769_v10  ;;  %v117_v0 = vld [vmem:[%s3329_s1 + $0x278] sm:$0xff]  ;;  %v148_v1 = vld [vmem:[%s3329_s1 + $0x370] sm:$0xff]  ;;  %v1819_v2 = vpack.c.bf16 %v165_v59, %v164_v58  ;;  %v183_v5 = vld [vmem:[%s3329_s1 + $0x488] sm:$0xff] }
  0x2e   :  { %1772 = vmatprep.subr.bf16.mxu0 %v1771_v12  ;;  %v149_v3 = vld [vmem:[%s3329_s1 + $0x378] sm:$0xff]  ;;  %v214_v6 = vld [vmem:[%s3329_s1 + $0x580] sm:$0xff]  ;;  %v215_v7 = vld [vmem:[%s3329_s1 + $0x588] sm:$0xff]  ;;  %v1789_v8 = vpack.c.bf16 %v117_v0, %v116_v63  ;;  %v1823_v10 = vpack.c.bf16 %v183_v5, %v182_v4 }
  0x2f   :  { %1802 = vmatpush3.bf16.msra.mxu1 %v1801_v11  ;;  %v1821_v9 = vpack.c.bf16 %v149_v3, %v148_v1  ;;  %v166_v11 = vld [vmem:[%s3329_s1 + $0x400] sm:$0xff]  ;;  %v167_v12 = vld [vmem:[%s3329_s1 + $0x408] sm:$0xff]  ;;  %v1855_v14 = vpack.c.bf16 %v215_v7, %v214_v6  ;;  %v185_v17 = vld [vmem:[%s3329_s1 + $0x498] sm:$0xff] }
  0x30   :  { %1804 = vmatprep.subr.bf16.mxu1 %v1803_v16  ;;  %v198_v13 = vld [vmem:[%s3329_s1 + $0x500] sm:$0xff]  ;;  %v199_v15 = vld [vmem:[%s3329_s1 + $0x508] sm:$0xff]  ;;  %v184_v16 = vld [vmem:[%s3329_s1 + $0x490] sm:$0xff]  ;;  %v1825_v21 = vpack.c.bf16 %v167_v12, %v166_v11 }
  0x31   :  { %1774 = vmatpush3.bf16.msra.mxu0 %v1773_v22  ;;  %v216_v18 = vld [vmem:[%s3329_s1 + $0x590] sm:$0xff]  ;;  %v217_v19 = vld [vmem:[%s3329_s1 + $0x598] sm:$0xff]  ;;  %v18_v20 = vld [vmem:[%s3330_s0 + $0x20] sm:$0xff]  ;;  %v1857_v23 = vpack.c.bf16 %v199_v15, %v198_v13  ;;  %v1827_v24 = vpack.c.bf16 %v185_v17, %v184_v16 }
  0x32   :  { %1776 = vmatprep.subr.bf16.mxu0 %v1775_v26  ;;  %v20_v22 = vld [vmem:[%s3330_s0 + $0x30] sm:$0xff]  ;;  %v169_v26 = vld [vmem:[%s3329_s1 + $0x418] sm:$0xff]  ;;  %v1859_v28 = vpack.c.bf16 %v217_v19, %v216_v18  ;;  %v187_v31 = vld [vmem:[%s3329_s1 + $0x4a8] sm:$0xff] }
  0x33   :  { %1806 = vmatpush3.bf16.msra.mxu1 %v1805_v25  ;;  %v168_v25 = vld [vmem:[%s3329_s1 + $0x410] sm:$0xff]  ;;  %v201_v29 = vld [vmem:[%s3329_s1 + $0x518] sm:$0xff]  ;;  %v218_v32 = vld [vmem:[%s3329_s1 + $0x5a0] sm:$0xff] }
  0x34   :  { %1808 = vmatprep.subr.bf16.mxu1 %v1807_v30  ;;  %v200_v27 = vld [vmem:[%s3329_s1 + $0x510] sm:$0xff]  ;;  %v186_v30 = vld [vmem:[%s3329_s1 + $0x4a0] sm:$0xff]  ;;  %v219_v33 = vld [vmem:[%s3329_s1 + $0x5a8] sm:$0xff]  ;;  %v1829_v35 = vpack.c.bf16 %v169_v26, %v168_v25 }
  0x35   :  { %1778 = vmatpush3.bf16.msra.mxu0 %v1777_v36  ;;  %v23_v34 = vld [vmem:[%s3330_s0 + $0x48] sm:$0xff]  ;;  %v25_v36 = vld [vmem:[%s3330_s0 + $0x58] sm:$0xff]  ;;  %v170_v39 = vld [vmem:[%s3329_s1 + $0x420] sm:$0xff] }
  0x36   :  { %1780 = vmatprep.subr.bf16.mxu0 %v1779_v38  ;;  %v1831_v38 = vpack.c.bf16 %v187_v31, %v186_v30  ;;  %v171_v40 = vld [vmem:[%s3329_s1 + $0x428] sm:$0xff]  ;;  %v202_v41 = vld [vmem:[%s3329_s1 + $0x520] sm:$0xff]  ;;  %v188_v44 = vld [vmem:[%s3329_s1 + $0x4b0] sm:$0xff] }
  0x37   :  { %1810 = vmatpush3.bf16.msra.mxu1 %v1809_v37  ;;  %v1861_v37 = vpack.c.bf16 %v201_v29, %v200_v27  ;;  %v203_v43 = vld [vmem:[%s3329_s1 + $0x528] sm:$0xff]  ;;  %v189_v45 = vld [vmem:[%s3329_s1 + $0x4b8] sm:$0xff]  ;;  %v220_v46 = vld [vmem:[%s3329_s1 + $0x5b0] sm:$0xff] }
  0x38   :  { %1812 = vmatprep.subr.bf16.mxu1 %v1811_v42  ;;  %v1863_v42 = vpack.c.bf16 %v219_v33, %v218_v32  ;;  %v221_v47 = vld [vmem:[%s3329_s1 + $0x5b8] sm:$0xff]  ;;  %v172_v51 = vld [vmem:[%s3329_s1 + $0x430] sm:$0xff]  ;;  %v190_v56 = vld [vmem:[%s3329_s1 + $0x4c0] sm:$0xff] }
  0x39   :  { %1782 = vmatpush3.bf16.msra.mxu0 %v1781_v48  ;;  %v1833_v48 = vpack.c.bf16 %v171_v40, %v170_v39  ;;  %v173_v52 = vld [vmem:[%s3329_s1 + $0x438] sm:$0xff]  ;;  %v204_v53 = vld [vmem:[%s3329_s1 + $0x530] sm:$0xff]  ;;  %v191_v57 = vld [vmem:[%s3329_s1 + $0x4c8] sm:$0xff] }
  0x3a   :  { %1784 = vmatprep.subr.bf16.mxu0 %v1783_v50  ;;  %v1835_v50 = vpack.c.bf16 %v189_v45, %v188_v44  ;;  %v205_v55 = vld [vmem:[%s3329_s1 + $0x538] sm:$0xff]  ;;  %v222_v58 = vld [vmem:[%s3329_s1 + $0x5c0] sm:$0xff]  ;;  %v223_v59 = vld [vmem:[%s3329_s1 + $0x5c8] sm:$0xff] }
  0x3b   :  { %1814 = vmatpush3.bf16.msra.mxu1 %v1813_v49  ;;  %v1865_v49 = vpack.c.bf16 %v203_v43, %v202_v41  ;;  %v174_v63 = vld [vmem:[%s3329_s1 + $0x440] sm:$0xff]  ;;  %v175_v0 = vld [vmem:[%s3329_s1 + $0x448] sm:$0xff]  ;;  %v192_v4 = vld [vmem:[%s3329_s1 + $0x4d0] sm:$0xff] }
  0x3c   :  { %1816 = vmatprep.subr.bf16.mxu1 %v1815_v54  ;;  %v1867_v54 = vpack.c.bf16 %v221_v47, %v220_v46  ;;  %v206_v1 = vld [vmem:[%s3329_s1 + $0x540] sm:$0xff]  ;;  %v207_v3 = vld [vmem:[%s3329_s1 + $0x548] sm:$0xff]  ;;  %v193_v5 = vld [vmem:[%s3329_s1 + $0x4d8] sm:$0xff] }
  0x3d   :  { %1786 = vmatpush3.bf16.msra.mxu0 %v1785_v60  ;;  %v1837_v60 = vpack.c.bf16 %v173_v52, %v172_v51  ;;  %v224_v6 = vld [vmem:[%s3329_s1 + $0x5d0] sm:$0xff]  ;;  %v225_v7 = vld [vmem:[%s3329_s1 + $0x5d8] sm:$0xff]  ;;  %v194_v16 = vld [vmem:[%s3329_s1 + $0x4e0] sm:$0xff] }
  0x3e   :  { %1788 = vmatprep.subr.bf16.mxu0 %v1787_v62  ;;  %v1839_v62 = vpack.c.bf16 %v191_v57, %v190_v56  ;;  %v176_v11 = vld [vmem:[%s3329_s1 + $0x450] sm:$0xff]  ;;  %v177_v12 = vld [vmem:[%s3329_s1 + $0x458] sm:$0xff]  ;;  %v195_v17 = vld [vmem:[%s3329_s1 + $0x4e8] sm:$0xff] }
  0x3f   :  { %1818 = vmatpush3.bf16.msra.mxu1 %v1817_v61  ;;  %v1869_v61 = vpack.c.bf16 %v205_v55, %v204_v53  ;;  %v208_v13 = vld [vmem:[%s3329_s1 + $0x550] sm:$0xff]  ;;  %v209_v15 = vld [vmem:[%s3329_s1 + $0x558] sm:$0xff]  ;;  %v226_v18 = vld [vmem:[%s3329_s1 + $0x5e0] sm:$0xff] }
  0x40   :  { %1820 = vmatprep.subr.bf16.mxu1 %v1819_v2  ;;  %v1871_v2 = vpack.c.bf16 %v223_v59, %v222_v58  ;;  %v227_v19 = vld [vmem:[%s3329_s1 + $0x5e8] sm:$0xff]  ;;  %v210_v25 = vld [vmem:[%s3329_s1 + $0x560] sm:$0xff]  ;;  %v197_v29 = vld [vmem:[%s3329_s1 + $0x4f8] sm:$0xff] }
  0x41   :  { %1790 = vmatpush3.bf16.msra.mxu0 %v1789_v8  ;;  %v1841_v8 = vpack.c.bf16 %v175_v0, %v174_v63  ;;  %v1879_v26 = vpack.c.bf16 %v227_v19, %v226_v18  ;;  %v211_v27 = vld [vmem:[%s3329_s1 + $0x568] sm:$0xff]  ;;  %v228_v30 = vld [vmem:[%s3329_s1 + $0x5f0] sm:$0xff]  ;;  %v229_v31 = vld [vmem:[%s3329_s1 + $0x5f8] sm:$0xff] }
  0x42   :  { %1824 = vmatprep.subr.bf16.mxu0 %v1823_v10  ;;  %v1843_v10 = vpack.c.bf16 %v193_v5, %v192_v4  ;;  %v1881_v33 = vpack.c.bf16 %v211_v27, %v210_v25  ;;  %v213_v39 = vld [vmem:[%s3329_s1 + $0x578] sm:$0xff]  ;;  %v246_v40 = vld [vmem:[%s3329_s1 + $0x680] sm:$0xff]  ;;  %v247_v41 = vld [vmem:[%s3329_s1 + $0x688] sm:$0xff] }
  0x43   :  { %1822 = vmatpush3.bf16.msra.mxu1 %v1821_v9  ;;  %v1873_v9 = vpack.c.bf16 %v207_v3, %v206_v1  ;;  %v279_v43 = vld [vmem:[%s3329_s1 + $0x788] sm:$0xff]  ;;  %v1887_v46 = vpack.c.bf16 %v247_v41, %v246_v40  ;;  %v230_v47 = vld [vmem:[%s3329_s1 + $0x600] sm:$0xff]  ;;  %v248_v52 = vld [vmem:[%s3329_s1 + $0x690] sm:$0xff] }
  0x44   :  { %1856 = vmatprep.subr.bf16.mxu1 %v1855_v14  ;;  %634 = vmatmul.mubr.f32.vlgmr.msra.gmra.mrb[2].mxu0 %v18_v20  ;;  %v1875_v14 = vpack.c.bf16 %v225_v7, %v224_v6  ;;  %v1845_v20 = vpack.c.bf16 %v177_v12, %v176_v11  ;;  %v263_v51 = vld [vmem:[%s3329_s1 + $0x708] sm:$0xff]  ;;  %v249_v53 = vld [vmem:[%s3329_s1 + $0x698] sm:$0xff]  ;;  %v22_v56 = vld [vmem:[%s3330_s0 + $0x40] sm:$0xff] }
  0x45   :  { %1826 = vmatpush3.bf16.msra.mxu0 %v1825_v21  ;;  %773 = vmatprep.mubr.f32.mxu0 %v23_v34  ;;  %v1877_v21 = vpack.c.bf16 %v209_v15, %v208_v13  ;;  %v281_v55 = vld [vmem:[%s3329_s1 + $0x798] sm:$0xff]  ;;  %v24_v58 = vld [vmem:[%s3330_s0 + $0x50] sm:$0xff]  ;;  %v251_v3 = vld [vmem:[%s3329_s1 + $0x6a8] sm:$0xff] }
  0x46   :  { %704 = vmatmul.mubr.f32.vlgmr.msra.gmra.mrb[2].mxu1 %v20_v22  ;;  %1828 = vmatprep.subr.bf16.mxu0 %v1827_v24  ;;  %v1847_v22 = vpack.c.bf16 %v195_v17, %v194_v16  ;;  %v179_v24 = vld [vmem:[%s3329_s1 + $0x468] sm:$0xff]  ;;  %v264_v63 = vld [vmem:[%s3329_s1 + $0x710] sm:$0xff]  ;;  %v265_v1 = vld [vmem:[%s3329_s1 + $0x718] sm:$0xff] }
  0x47   :  { %1858 = vmatpush3.bf16.msra.mxu1 %v1857_v23  ;;  %843 = vmatprep.mubr.f32.mxu1 %v25_v36  ;;  %v178_v23 = vld [vmem:[%s3329_s1 + $0x460] sm:$0xff]  ;;  %v181_v36 = vld [vmem:[%s3329_s1 + $0x478] sm:$0xff]  ;;  %v283_v5 = vld [vmem:[%s3329_s1 + $0x7a8] sm:$0xff] }
  0x48   :  { %1860 = vmatprep.subr.bf16.mxu1 %v1859_v28  ;;  %v196_v28 = vld [vmem:[%s3329_s1 + $0x4f0] sm:$0xff]  ;;  %v1849_v32 = vpack.c.bf16 %v179_v24, %v178_v23  ;;  %v282_v4 = vld [vmem:[%s3329_s1 + $0x7a0] sm:$0xff]  ;;  %v27_v6 = vld [vmem:[%s3330_s0 + $0x68] sm:$0xff] }
  0x49   :  { %1830 = vmatpush3.bf16.msra.mxu0 %v1829_v35  ;;  %v1851_v34 = vpack.c.bf16 %v197_v29, %v196_v28  ;;  %v180_v35 = vld [vmem:[%s3329_s1 + $0x470] sm:$0xff]  ;;  %v234_v11 = vld [vmem:[%s3329_s1 + $0x620] sm:$0xff]  ;;  %v235_v12 = vld [vmem:[%s3329_s1 + $0x628] sm:$0xff] }
  0x4a   :  { %1832 = vmatprep.subr.bf16.mxu0 %v1831_v38  ;;  %v1883_v38 = vpack.c.bf16 %v229_v31, %v228_v30  ;;  %v1853_v44 = vpack.c.bf16 %v181_v36, %v180_v35  ;;  %v266_v13 = vld [vmem:[%s3329_s1 + $0x720] sm:$0xff]  ;;  %v267_v15 = vld [vmem:[%s3329_s1 + $0x728] sm:$0xff]  ;;  %v252_v16 = vld [vmem:[%s3329_s1 + $0x6b0] sm:$0xff] }
  0x4b   :  { %1862 = vmatpush3.bf16.msra.mxu1 %v1861_v37  ;;  %v212_v37 = vld [vmem:[%s3329_s1 + $0x570] sm:$0xff]  ;;  %v253_v17 = vld [vmem:[%s3329_s1 + $0x6b8] sm:$0xff]  ;;  %v254_v28 = vld [vmem:[%s3329_s1 + $0x6c0] sm:$0xff] }
  0x4c   :  { %1864 = vmatprep.subr.bf16.mxu1 %v1863_v42  ;;  %v278_v42 = vld [vmem:[%s3329_s1 + $0x780] sm:$0xff]  ;;  %v1885_v45 = vpack.c.bf16 %v213_v39, %v212_v37  ;;  %v284_v18 = vld [vmem:[%s3329_s1 + $0x7b0] sm:$0xff]  ;;  %v285_v19 = vld [vmem:[%s3329_s1 + $0x7b8] sm:$0xff] }
  0x4d   :  { %1834 = vmatpush3.bf16.msra.mxu0 %v1833_v48  ;;  %v231_v48 = vld [vmem:[%s3329_s1 + $0x608] sm:$0xff]  ;;  %v236_v23 = vld [vmem:[%s3329_s1 + $0x630] sm:$0xff]  ;;  %v237_v24 = vld [vmem:[%s3329_s1 + $0x638] sm:$0xff] }
  0x4e   :  { %1836 = vmatprep.subr.bf16.mxu0 %v1835_v50  ;;  %v1919_v50 = vpack.c.bf16 %v279_v43, %v278_v42  ;;  %v1889_v57 = vpack.c.bf16 %v231_v48, %v230_v47  ;;  %v268_v25 = vld [vmem:[%s3329_s1 + $0x730] sm:$0xff]  ;;  %v269_v27 = vld [vmem:[%s3329_s1 + $0x738] sm:$0xff]  ;;  %v255_v29 = vld [vmem:[%s3329_s1 + $0x6c8] sm:$0xff] }
  0x4f   :  { %1866 = vmatpush3.bf16.msra.mxu1 %v1865_v49  ;;  %v262_v49 = vld [vmem:[%s3329_s1 + $0x700] sm:$0xff]  ;;  %v287_v31 = vld [vmem:[%s3329_s1 + $0x7c8] sm:$0xff]  ;;  %v256_v40 = vld [vmem:[%s3329_s1 + $0x6d0] sm:$0xff] }
  0x50   :  { %1868 = vmatprep.subr.bf16.mxu1 %v1867_v54  ;;  %v280_v54 = vld [vmem:[%s3329_s1 + $0x790] sm:$0xff]  ;;  %v1921_v59 = vpack.c.bf16 %v263_v51, %v262_v49  ;;  %v286_v30 = vld [vmem:[%s3329_s1 + $0x7c0] sm:$0xff]  ;;  %v239_v36 = vld [vmem:[%s3329_s1 + $0x648] sm:$0xff] }
  0x51   :  { %1838 = vmatpush3.bf16.msra.mxu0 %v1837_v60  ;;  %v1891_v60 = vpack.c.bf16 %v249_v53, %v248_v52  ;;  %v1923_v0 = vpack.c.bf16 %v281_v55, %v280_v54  ;;  %v238_v35 = vld [vmem:[%s3329_s1 + $0x640] sm:$0xff]  ;;  %v271_v39 = vld [vmem:[%s3329_s1 + $0x748] sm:$0xff]  ;;  %v257_v41 = vld [vmem:[%s3329_s1 + $0x6d8] sm:$0xff] }
  0x52   :  { %1840 = vmatprep.subr.bf16.mxu0 %v1839_v62  ;;  %v233_v62 = vld [vmem:[%s3329_s1 + $0x618] sm:$0xff]  ;;  %v270_v37 = vld [vmem:[%s3329_s1 + $0x740] sm:$0xff]  ;;  %v288_v42 = vld [vmem:[%s3329_s1 + $0x7d0] sm:$0xff] }
  0x53   :  { %1870 = vmatpush3.bf16.msra.mxu1 %v1869_v61  ;;  %v232_v61 = vld [vmem:[%s3329_s1 + $0x610] sm:$0xff]  ;;  %v289_v43 = vld [vmem:[%s3329_s1 + $0x7d8] sm:$0xff]  ;;  %v258_v52 = vld [vmem:[%s3329_s1 + $0x6e0] sm:$0xff] }
  0x54   :  { %1872 = vmatprep.subr.bf16.mxu1 %v1871_v2  ;;  %v250_v2 = vld [vmem:[%s3329_s1 + $0x6a0] sm:$0xff]  ;;  %v1893_v7 = vpack.c.bf16 %v233_v62, %v232_v61  ;;  %v240_v47 = vld [vmem:[%s3329_s1 + $0x650] sm:$0xff]  ;;  %v241_v48 = vld [vmem:[%s3329_s1 + $0x658] sm:$0xff] }
  0x55   :  { %1842 = vmatpush3.bf16.msra.mxu0 %v1841_v8  ;;  %v29_v8 = vld [vmem:[%s3330_s0 + $0x78] sm:$0xff]  ;;  %v272_v49 = vld [vmem:[%s3329_s1 + $0x750] sm:$0xff]  ;;  %v259_v53 = vld [vmem:[%s3329_s1 + $0x6e8] sm:$0xff] }
  0x56   :  { %1844 = vmatprep.subr.bf16.mxu0 %v1843_v10  ;;  %v1895_v10 = vpack.c.bf16 %v251_v3, %v250_v2  ;;  %v273_v51 = vld [vmem:[%s3329_s1 + $0x758] sm:$0xff]  ;;  %v290_v54 = vld [vmem:[%s3329_s1 + $0x7e0] sm:$0xff]  ;;  %v291_v55 = vld [vmem:[%s3329_s1 + $0x7e8] sm:$0xff] }
  0x57   :  { %1874 = vmatpush3.bf16.msra.mxu1 %v1873_v9  ;;  %v1925_v9 = vpack.c.bf16 %v265_v1, %v264_v63  ;;  %v274_v61 = vld [vmem:[%s3329_s1 + $0x760] sm:$0xff]  ;;  %v1943_v62 = vpack.c.bf16 %v291_v55, %v290_v54  ;;  %v275_v63 = vld [vmem:[%s3329_s1 + $0x768] sm:$0xff]  ;;  %v261_v1 = vld [vmem:[%s3329_s1 + $0x6f8] sm:$0xff] }
  0x58   :  { %1876 = vmatprep.subr.bf16.mxu1 %v1875_v14  ;;  %v1927_v14 = vpack.c.bf16 %v283_v5, %v282_v4  ;;  %v292_v2 = vld [vmem:[%s3329_s1 + $0x7f0] sm:$0xff]  ;;  %v293_v3 = vld [vmem:[%s3329_s1 + $0x7f8] sm:$0xff]  ;;  %v1945_v5 = vpack.c.bf16 %v275_v63, %v274_v61 }
  0x59   :  { %1846 = vmatpush3.bf16.msra.mxu0 %v1845_v20  ;;  %v1897_v20 = vpack.c.bf16 %v235_v12, %v234_v11  ;;  %v277_v11 = vld [vmem:[%s3329_s1 + $0x778] sm:$0xff]  ;;  %v310_v12 = vld [vmem:[%s3329_s1 + $0x880] sm:$0xff]  ;;  %v348_v54 = vld [vmem:[%s3329_s1 + $0x9b0] sm:$0xff] }
  0x5a   :  { %1848 = vmatprep.subr.bf16.mxu0 %v1847_v22  ;;  %v1899_v22 = vpack.c.bf16 %v253_v17, %v252_v16  ;;  %v349_v55 = vld [vmem:[%s3329_s1 + $0x9b8] sm:$0xff]  ;;  %v332_v61 = vld [vmem:[%s3329_s1 + $0x930] sm:$0xff] }
  0x5b   :  { %1878 = vmatpush3.bf16.msra.mxu1 %v1877_v21  ;;  %v1929_v21 = vpack.c.bf16 %v267_v15, %v266_v13  ;;  %v311_v13 = vld [vmem:[%s3329_s1 + $0x888] sm:$0xff]  ;;  %v333_v63 = vld [vmem:[%s3329_s1 + $0x938] sm:$0xff] }
  0x5c   :  { %1880 = vmatprep.subr.bf16.mxu1 %v1879_v26  ;;  %v1931_v26 = vpack.c.bf16 %v285_v19, %v284_v18  ;;  %v343_v15 = vld [vmem:[%s3329_s1 + $0x988] sm:$0xff]  ;;  %v1951_v18 = vpack.c.bf16 %v311_v13, %v310_v12  ;;  %v294_v19 = vld [vmem:[%s3329_s1 + $0x800] sm:$0xff]  ;;  %v320_v12 = vld [vmem:[%s3329_s1 + $0x8d0] sm:$0xff] }
  0x5d   :  { %1850 = vmatpush3.bf16.msra.mxu0 %v1849_v32  ;;  %v1901_v32 = vpack.c.bf16 %v237_v24, %v236_v23  ;;  %v327_v23 = vld [vmem:[%s3329_s1 + $0x908] sm:$0xff]  ;;  %v312_v24 = vld [vmem:[%s3329_s1 + $0x890] sm:$0xff]  ;;  %v321_v13 = vld [vmem:[%s3329_s1 + $0x8d8] sm:$0xff] }
  0x5e   :  { %1852 = vmatprep.subr.bf16.mxu0 %v1851_v34  ;;  %v1903_v34 = vpack.c.bf16 %v255_v29, %v254_v28  ;;  %v26_v28 = vld [vmem:[%s3330_s0 + $0x60] sm:$0xff] }
  0x5f   :  { %1882 = vmatpush3.bf16.msra.mxu1 %v1881_v33  ;;  %v1933_v33 = vpack.c.bf16 %v269_v27, %v268_v25  ;;  %v313_v25 = vld [vmem:[%s3329_s1 + $0x898] sm:$0xff] }
  0x60   :  { %1884 = vmatprep.subr.bf16.mxu1 %v1883_v38  ;;  %v1935_v38 = vpack.c.bf16 %v287_v31, %v286_v30  ;;  %v345_v27 = vld [vmem:[%s3329_s1 + $0x998] sm:$0xff]  ;;  %v28_v30 = vld [vmem:[%s3330_s0 + $0x70] sm:$0xff] }
  0x61   :  { %1854 = vmatpush3.bf16.msra.mxu0 %v1853_v44  ;;  %v1905_v44 = vpack.c.bf16 %v239_v36, %v238_v35  ;;  %v328_v35 = vld [vmem:[%s3329_s1 + $0x910] sm:$0xff] }
  0x62   :  { %1888 = vmatprep.subr.bf16.mxu0 %v1887_v46  ;;  %v1907_v46 = vpack.c.bf16 %v257_v41, %v256_v40  ;;  %v346_v40 = vld [vmem:[%s3329_s1 + $0x9a0] sm:$0xff]  ;;  %v347_v41 = vld [vmem:[%s3329_s1 + $0x9a8] sm:$0xff] }
  0x63   :  { %1886 = vmatpush3.bf16.msra.mxu1 %v1885_v45  ;;  %v1937_v45 = vpack.c.bf16 %v271_v39, %v270_v37  ;;  %v329_v37 = vld [vmem:[%s3329_s1 + $0x918] sm:$0xff]  ;;  %v315_v39 = vld [vmem:[%s3329_s1 + $0x8a8] sm:$0xff] }
  0x64   :  { %1920 = vmatprep.subr.bf16.mxu1 %v1919_v50  ;;  %774 = vmatmul.mubr.f32.vlgmr.msra.gmra.mrb[4].mxu0 %v22_v56  ;;  %v1939_v50 = vpack.c.bf16 %v289_v43, %v288_v42  ;;  %v1909_v56 = vpack.c.bf16 %v241_v48, %v240_v47  ;;  %v31_v42 = vld [vmem:[%s3330_s0 + $0x88] sm:$0xff]  ;;  %v298_v47 = vld [vmem:[%s3329_s1 + $0x820] sm:$0xff] }
  0x65   :  { %1890 = vmatpush3.bf16.msra.mxu0 %v1889_v57  ;;  %913 = vmatprep.mubr.f32.mxu0 %v27_v6  ;;  %v1941_v57 = vpack.c.bf16 %v273_v51, %v272_v49  ;;  %v299_v48 = vld [vmem:[%s3329_s1 + $0x828] sm:$0xff]  ;;  %v330_v49 = vld [vmem:[%s3329_s1 + $0x920] sm:$0xff] }
  0x66   :  { %844 = vmatmul.mubr.f32.vlgmr.msra.gmra.mrb[4].mxu1 %v24_v58  ;;  %1892 = vmatprep.subr.bf16.mxu0 %v1891_v60  ;;  %v1911_v58 = vpack.c.bf16 %v259_v53, %v258_v52  ;;  %v243_v60 = vld [vmem:[%s3329_s1 + $0x668] sm:$0xff]  ;;  %v316_v52 = vld [vmem:[%s3329_s1 + $0x8b0] sm:$0xff]  ;;  %v317_v53 = vld [vmem:[%s3329_s1 + $0x8b8] sm:$0xff] }
  0x67   :  { %1922 = vmatpush3.bf16.msra.mxu1 %v1921_v59  ;;  %983 = vmatprep.mubr.f32.mxu1 %v29_v8  ;;  %v242_v59 = vld [vmem:[%s3329_s1 + $0x660] sm:$0xff]  ;;  %v245_v8 = vld [vmem:[%s3329_s1 + $0x678] sm:$0xff]  ;;  %v331_v51 = vld [vmem:[%s3329_s1 + $0x928] sm:$0xff] }
  0x68   :  { %1924 = vmatprep.subr.bf16.mxu1 %v1923_v0  ;;  %v260_v0 = vld [vmem:[%s3329_s1 + $0x6f0] sm:$0xff]  ;;  %v1913_v4 = vpack.c.bf16 %v243_v60, %v242_v59  ;;  %v301_v60 = vld [vmem:[%s3329_s1 + $0x838] sm:$0xff] }
  0x69   :  { %1894 = vmatpush3.bf16.msra.mxu0 %v1893_v7  ;;  %v1915_v6 = vpack.c.bf16 %v261_v1, %v260_v0  ;;  %v244_v7 = vld [vmem:[%s3329_s1 + $0x670] sm:$0xff]  ;;  %v318_v0 = vld [vmem:[%s3329_s1 + $0x8c0] sm:$0xff]  ;;  %v319_v1 = vld [vmem:[%s3329_s1 + $0x8c8] sm:$0xff] }
  0x6a   :  { %1896 = vmatprep.subr.bf16.mxu0 %v1895_v10  ;;  %v1947_v10 = vpack.c.bf16 %v293_v3, %v292_v2  ;;  %v1917_v16 = vpack.c.bf16 %v245_v8, %v244_v7  ;;  %v300_v59 = vld [vmem:[%s3329_s1 + $0x830] sm:$0xff]  ;;  %v350_v2 = vld [vmem:[%s3329_s1 + $0x9c0] sm:$0xff]  ;;  %v351_v3 = vld [vmem:[%s3329_s1 + $0x9c8] sm:$0xff] }
  0x6b   :  { %1926 = vmatpush3.bf16.msra.mxu1 %v1925_v9  ;;  %v276_v9 = vld [vmem:[%s3329_s1 + $0x770] sm:$0xff]  ;;  %v302_v7 = vld [vmem:[%s3329_s1 + $0x840] sm:$0xff]  ;;  %v303_v8 = vld [vmem:[%s3329_s1 + $0x848] sm:$0xff] }
  0x6c   :  { %1928 = vmatprep.subr.bf16.mxu1 %v1927_v14  ;;  %v342_v14 = vld [vmem:[%s3329_s1 + $0x980] sm:$0xff]  ;;  %v1949_v17 = vpack.c.bf16 %v277_v11, %v276_v9  ;;  %v335_v11 = vld [vmem:[%s3329_s1 + $0x948] sm:$0xff] }
  0x6d   :  { %1898 = vmatpush3.bf16.msra.mxu0 %v1897_v20  ;;  %v295_v20 = vld [vmem:[%s3329_s1 + $0x808] sm:$0xff]  ;;  %v334_v9 = vld [vmem:[%s3329_s1 + $0x940] sm:$0xff] }
  0x6e   :  { %1900 = vmatprep.subr.bf16.mxu0 %v1899_v22  ;;  %v1983_v22 = vpack.c.bf16 %v343_v15, %v342_v14  ;;  %v1953_v29 = vpack.c.bf16 %v295_v20, %v294_v19  ;;  %v352_v14 = vld [vmem:[%s3329_s1 + $0x9d0] sm:$0xff]  ;;  %v353_v15 = vld [vmem:[%s3329_s1 + $0x9d8] sm:$0xff] }
  0x6f   :  { %1930 = vmatpush3.bf16.msra.mxu1 %v1929_v21  ;;  %v326_v21 = vld [vmem:[%s3329_s1 + $0x900] sm:$0xff]  ;;  %v304_v19 = vld [vmem:[%s3329_s1 + $0x850] sm:$0xff]  ;;  %v305_v20 = vld [vmem:[%s3329_s1 + $0x858] sm:$0xff] }
  0x70   :  { %1932 = vmatprep.subr.bf16.mxu1 %v1931_v26  ;;  %v344_v26 = vld [vmem:[%s3329_s1 + $0x990] sm:$0xff]  ;;  %v1985_v31 = vpack.c.bf16 %v327_v23, %v326_v21  ;;  %v337_v23 = vld [vmem:[%s3329_s1 + $0x958] sm:$0xff] }
  0x71   :  { %1902 = vmatpush3.bf16.msra.mxu0 %v1901_v32  ;;  %v1955_v32 = vpack.c.bf16 %v313_v25, %v312_v24  ;;  %v1987_v36 = vpack.c.bf16 %v345_v27, %v344_v26  ;;  %v336_v21 = vld [vmem:[%s3329_s1 + $0x950] sm:$0xff]  ;;  %v322_v24 = vld [vmem:[%s3329_s1 + $0x8e0] sm:$0xff]  ;;  %v323_v25 = vld [vmem:[%s3329_s1 + $0x8e8] sm:$0xff] }
  0x72   :  { %1904 = vmatprep.subr.bf16.mxu0 %v1903_v34  ;;  %v297_v34 = vld [vmem:[%s3329_s1 + $0x818] sm:$0xff]  ;;  %v354_v26 = vld [vmem:[%s3329_s1 + $0x9e0] sm:$0xff]  ;;  %v355_v27 = vld [vmem:[%s3329_s1 + $0x9e8] sm:$0xff] }
  0x73   :  { %1934 = vmatpush3.bf16.msra.mxu1 %v1933_v33  ;;  %v296_v33 = vld [vmem:[%s3329_s1 + $0x810] sm:$0xff] }
  0x74   :  { %1936 = vmatprep.subr.bf16.mxu1 %v1935_v38  ;;  %v314_v38 = vld [vmem:[%s3329_s1 + $0x8a0] sm:$0xff]  ;;  %v1957_v43 = vpack.c.bf16 %v297_v34, %v296_v33  ;;  %v2007_v34 = vpack.c.bf16 %v355_v27, %v354_v26  ;;  %v412_v26 = vld [vmem:[%s3329_s1 + $0xbb0] sm:$0xff]  ;;  %v413_v27 = vld [vmem:[%s3329_s1 + $0xbb8] sm:$0xff] }
  0x75   :  { %1906 = vmatpush3.bf16.msra.mxu0 %v1905_v44  ;;  %v33_v44 = vld [vmem:[%s3330_s0 + $0x98] sm:$0xff]  ;;  %v338_v33 = vld [vmem:[%s3329_s1 + $0x960] sm:$0xff] }
  0x76   :  { %1908 = vmatprep.subr.bf16.mxu0 %v1907_v46  ;;  %v1959_v46 = vpack.c.bf16 %v315_v39, %v314_v38  ;;  %v356_v38 = vld [vmem:[%s3329_s1 + $0x9f0] sm:$0xff]  ;;  %v357_v39 = vld [vmem:[%s3329_s1 + $0x9f8] sm:$0xff] }
  0x77   :  { %1938 = vmatpush3.bf16.msra.mxu1 %v1937_v45  ;;  %v1989_v45 = vpack.c.bf16 %v329_v37, %v328_v35  ;;  %v339_v35 = vld [vmem:[%s3329_s1 + $0x968] sm:$0xff]  ;;  %v325_v37 = vld [vmem:[%s3329_s1 + $0x8f8] sm:$0xff] }
  0x78   :  { %1940 = vmatprep.subr.bf16.mxu1 %v1939_v50  ;;  %v1991_v50 = vpack.c.bf16 %v347_v41, %v346_v40  ;;  %v2009_v41 = vpack.c.bf16 %v339_v35, %v338_v33  ;;  %v396_v33 = vld [vmem:[%s3329_s1 + $0xb30] sm:$0xff]  ;;  %v397_v35 = vld [vmem:[%s3329_s1 + $0xb38] sm:$0xff] }
  0x79   :  { %1910 = vmatpush3.bf16.msra.mxu0 %v1909_v56  ;;  %v1961_v56 = vpack.c.bf16 %v299_v48, %v298_v47  ;;  %v341_v47 = vld [vmem:[%s3329_s1 + $0x978] sm:$0xff]  ;;  %v374_v48 = vld [vmem:[%s3329_s1 + $0xa80] sm:$0xff] }
  0x7a   :  { %1912 = vmatprep.subr.bf16.mxu0 %v1911_v58  ;;  %v1963_v58 = vpack.c.bf16 %v317_v53, %v316_v52 }
  0x7b   :  { %1942 = vmatpush3.bf16.msra.mxu1 %v1941_v57  ;;  %v1993_v57 = vpack.c.bf16 %v331_v51, %v330_v49  ;;  %v375_v49 = vld [vmem:[%s3329_s1 + $0xa88] sm:$0xff] }
  0x7c   :  { %1944 = vmatprep.subr.bf16.mxu1 %v1943_v62  ;;  %v1995_v62 = vpack.c.bf16 %v349_v55, %v348_v54  ;;  %v407_v51 = vld [vmem:[%s3329_s1 + $0xb88] sm:$0xff]  ;;  %v2015_v54 = vpack.c.bf16 %v375_v49, %v374_v48  ;;  %v358_v55 = vld [vmem:[%s3329_s1 + $0xa00] sm:$0xff]  ;;  %v384_v48 = vld [vmem:[%s3329_s1 + $0xad0] sm:$0xff] }
  0x7d   :  { %1914 = vmatpush3.bf16.msra.mxu0 %v1913_v4  ;;  %v1965_v4 = vpack.c.bf16 %v301_v60, %v300_v59  ;;  %v391_v59 = vld [vmem:[%s3329_s1 + $0xb08] sm:$0xff]  ;;  %v376_v60 = vld [vmem:[%s3329_s1 + $0xa90] sm:$0xff]  ;;  %v385_v49 = vld [vmem:[%s3329_s1 + $0xad8] sm:$0xff] }
  0x7e   :  { %1916 = vmatprep.subr.bf16.mxu0 %v1915_v6  ;;  %v1967_v6 = vpack.c.bf16 %v319_v1, %v318_v0  ;;  %v30_v0 = vld [vmem:[%s3330_s0 + $0x80] sm:$0xff] }
  0x7f   :  { %1946 = vmatpush3.bf16.msra.mxu1 %v1945_v5  ;;  %v1997_v5 = vpack.c.bf16 %v333_v63, %v332_v61  ;;  %v377_v61 = vld [vmem:[%s3329_s1 + $0xa98] sm:$0xff] }
  0x80   :  { %1948 = vmatprep.subr.bf16.mxu1 %v1947_v10  ;;  %v1999_v10 = vpack.c.bf16 %v351_v3, %v350_v2  ;;  %v409_v63 = vld [vmem:[%s3329_s1 + $0xb98] sm:$0xff]  ;;  %v32_v2 = vld [vmem:[%s3330_s0 + $0x90] sm:$0xff] }
  0x81   :  { %1918 = vmatpush3.bf16.msra.mxu0 %v1917_v16  ;;  %v1969_v16 = vpack.c.bf16 %v303_v8, %v302_v7  ;;  %v392_v7 = vld [vmem:[%s3329_s1 + $0xb10] sm:$0xff] }
  0x82   :  { %1952 = vmatprep.subr.bf16.mxu0 %v1951_v18  ;;  %v1971_v18 = vpack.c.bf16 %v321_v13, %v320_v12  ;;  %v410_v12 = vld [vmem:[%s3329_s1 + $0xba0] sm:$0xff]  ;;  %v411_v13 = vld [vmem:[%s3329_s1 + $0xba8] sm:$0xff] }
  0x83   :  { %1950 = vmatpush3.bf16.msra.mxu1 %v1949_v17  ;;  %v2001_v17 = vpack.c.bf16 %v335_v11, %v334_v9  ;;  %v393_v9 = vld [vmem:[%s3329_s1 + $0xb18] sm:$0xff]  ;;  %v379_v11 = vld [vmem:[%s3329_s1 + $0xaa8] sm:$0xff] }
  0x84   :  { %1984 = vmatprep.subr.bf16.mxu1 %v1983_v22  ;;  %914 = vmatmul.mubr.f32.vlgmr.msra.gmra.mrb[6].mxu0 %v26_v28  ;;  %v2003_v22 = vpack.c.bf16 %v353_v15, %v352_v14  ;;  %v1973_v28 = vpack.c.bf16 %v305_v20, %v304_v19  ;;  %v35_v14 = vld [vmem:[%s3330_s0 + $0xa8] sm:$0xff]  ;;  %v362_v19 = vld [vmem:[%s3329_s1 + $0xa20] sm:$0xff] }
  0x85   :  { %1954 = vmatpush3.bf16.msra.mxu0 %v1953_v29  ;;  %1053 = vmatprep.mubr.f32.mxu0 %v31_v42  ;;  %v2005_v29 = vpack.c.bf16 %v337_v23, %v336_v21  ;;  %v363_v20 = vld [vmem:[%s3329_s1 + $0xa28] sm:$0xff]  ;;  %v394_v21 = vld [vmem:[%s3329_s1 + $0xb20] sm:$0xff] }
  0x86   :  { %984 = vmatmul.mubr.f32.vlgmr.msra.gmra.mrb[6].mxu1 %v28_v30  ;;  %1956 = vmatprep.subr.bf16.mxu0 %v1955_v32  ;;  %v1975_v30 = vpack.c.bf16 %v323_v25, %v322_v24  ;;  %v307_v32 = vld [vmem:[%s3329_s1 + $0x868] sm:$0xff]  ;;  %v380_v24 = vld [vmem:[%s3329_s1 + $0xab0] sm:$0xff]  ;;  %v381_v25 = vld [vmem:[%s3329_s1 + $0xab8] sm:$0xff] }
  0x87   :  { %1986 = vmatpush3.bf16.msra.mxu1 %v1985_v31  ;;  %1123 = vmatprep.mubr.f32.mxu1 %v33_v44  ;;  %v306_v31 = vld [vmem:[%s3329_s1 + $0x860] sm:$0xff]  ;;  %v309_v44 = vld [vmem:[%s3329_s1 + $0x878] sm:$0xff]  ;;  %v395_v23 = vld [vmem:[%s3329_s1 + $0xb28] sm:$0xff] }
  0x88   :  { %1988 = vmatprep.subr.bf16.mxu1 %v1987_v36  ;;  %v324_v36 = vld [vmem:[%s3329_s1 + $0x8f0] sm:$0xff]  ;;  %v1977_v40 = vpack.c.bf16 %v307_v32, %v306_v31  ;;  %v365_v32 = vld [vmem:[%s3329_s1 + $0xa38] sm:$0xff] }
  0x89   :  { %1958 = vmatpush3.bf16.msra.mxu0 %v1957_v43  ;;  %v1979_v42 = vpack.c.bf16 %v325_v37, %v324_v36  ;;  %v308_v43 = vld [vmem:[%s3329_s1 + $0x870] sm:$0xff]  ;;  %v382_v36 = vld [vmem:[%s3329_s1 + $0xac0] sm:$0xff]  ;;  %v383_v37 = vld [vmem:[%s3329_s1 + $0xac8] sm:$0xff] }
  0x8a   :  { %1960 = vmatprep.subr.bf16.mxu0 %v1959_v46  ;;  %v2011_v46 = vpack.c.bf16 %v357_v39, %v356_v38  ;;  %v1981_v52 = vpack.c.bf16 %v309_v44, %v308_v43  ;;  %v364_v31 = vld [vmem:[%s3329_s1 + $0xa30] sm:$0xff]  ;;  %v414_v38 = vld [vmem:[%s3329_s1 + $0xbc0] sm:$0xff]  ;;  %v415_v39 = vld [vmem:[%s3329_s1 + $0xbc8] sm:$0xff] }
  0x8b   :  { %1990 = vmatpush3.bf16.msra.mxu1 %v1989_v45  ;;  %v340_v45 = vld [vmem:[%s3329_s1 + $0x970] sm:$0xff]  ;;  %v366_v43 = vld [vmem:[%s3329_s1 + $0xa40] sm:$0xff]  ;;  %v367_v44 = vld [vmem:[%s3329_s1 + $0xa48] sm:$0xff] }
  0x8c   :  { %1992 = vmatprep.subr.bf16.mxu1 %v1991_v50  ;;  %v406_v50 = vld [vmem:[%s3329_s1 + $0xb80] sm:$0xff]  ;;  %v2013_v53 = vpack.c.bf16 %v341_v47, %v340_v45  ;;  %v399_v47 = vld [vmem:[%s3329_s1 + $0xb48] sm:$0xff] }
  0x8d   :  { %1962 = vmatpush3.bf16.msra.mxu0 %v1961_v56  ;;  %v359_v56 = vld [vmem:[%s3329_s1 + $0xa08] sm:$0xff]  ;;  %v398_v45 = vld [vmem:[%s3329_s1 + $0xb40] sm:$0xff] }
  0x8e   :  { %1964 = vmatprep.subr.bf16.mxu0 %v1963_v58  ;;  %v2047_v58 = vpack.c.bf16 %v407_v51, %v406_v50  ;;  %v2017_v1 = vpack.c.bf16 %v359_v56, %v358_v55  ;;  %v416_v50 = vld [vmem:[%s3329_s1 + $0xbd0] sm:$0xff]  ;;  %v417_v51 = vld [vmem:[%s3329_s1 + $0xbd8] sm:$0xff] }
  0x8f   :  { %1994 = vmatpush3.bf16.msra.mxu1 %v1993_v57  ;;  %v390_v57 = vld [vmem:[%s3329_s1 + $0xb00] sm:$0xff]  ;;  %v368_v55 = vld [vmem:[%s3329_s1 + $0xa50] sm:$0xff]  ;;  %v369_v56 = vld [vmem:[%s3329_s1 + $0xa58] sm:$0xff] }
  0x90   :  { %1996 = vmatprep.subr.bf16.mxu1 %v1995_v62  ;;  %v408_v62 = vld [vmem:[%s3329_s1 + $0xb90] sm:$0xff]  ;;  %v2049_v3 = vpack.c.bf16 %v391_v59, %v390_v57  ;;  %v401_v59 = vld [vmem:[%s3329_s1 + $0xb58] sm:$0xff] }
  0x91   :  { %1966 = vmatpush3.bf16.msra.mxu0 %v1965_v4  ;;  %v2019_v4 = vpack.c.bf16 %v377_v61, %v376_v60  ;;  %v2051_v8 = vpack.c.bf16 %v409_v63, %v408_v62  ;;  %v400_v57 = vld [vmem:[%s3329_s1 + $0xb50] sm:$0xff]  ;;  %v386_v60 = vld [vmem:[%s3329_s1 + $0xae0] sm:$0xff]  ;;  %v387_v61 = vld [vmem:[%s3329_s1 + $0xae8] sm:$0xff] }
  0x92   :  { %1968 = vmatprep.subr.bf16.mxu0 %v1967_v6  ;;  %v361_v6 = vld [vmem:[%s3329_s1 + $0xa18] sm:$0xff]  ;;  %v418_v62 = vld [vmem:[%s3329_s1 + $0xbe0] sm:$0xff]  ;;  %v419_v63 = vld [vmem:[%s3329_s1 + $0xbe8] sm:$0xff] }
  0x93   :  { %1998 = vmatpush3.bf16.msra.mxu1 %v1997_v5  ;;  %v360_v5 = vld [vmem:[%s3329_s1 + $0xa10] sm:$0xff] }
  0x94   :  { %2000 = vmatprep.subr.bf16.mxu1 %v1999_v10  ;;  %v378_v10 = vld [vmem:[%s3329_s1 + $0xaa0] sm:$0xff]  ;;  %v2021_v15 = vpack.c.bf16 %v361_v6, %v360_v5  ;;  %v2071_v6 = vpack.c.bf16 %v419_v63, %v418_v62 }
  0x95   :  { %1970 = vmatpush3.bf16.msra.mxu0 %v1969_v16  ;;  %v37_v16 = vld [vmem:[%s3330_s0 + $0xb8] sm:$0xff]  ;;  %v402_v5 = vld [vmem:[%s3329_s1 + $0xb60] sm:$0xff] }
  0x96   :  { %1972 = vmatprep.subr.bf16.mxu0 %v1971_v18  ;;  %v2023_v18 = vpack.c.bf16 %v379_v11, %v378_v10  ;;  %v420_v10 = vld [vmem:[%s3329_s1 + $0xbf0] sm:$0xff]  ;;  %v421_v11 = vld [vmem:[%s3329_s1 + $0xbf8] sm:$0xff] }
  0x97   :  { %2002 = vmatpush3.bf16.msra.mxu1 %v2001_v17  ;;  %v2053_v17 = vpack.c.bf16 %v393_v9, %v392_v7  ;;  %v403_v7 = vld [vmem:[%s3329_s1 + $0xb68] sm:$0xff]  ;;  %v389_v9 = vld [vmem:[%s3329_s1 + $0xaf8] sm:$0xff] }
  0x98   :  { %2004 = vmatprep.subr.bf16.mxu1 %v2003_v22  ;;  %v2055_v22 = vpack.c.bf16 %v411_v13, %v410_v12  ;;  %v2073_v13 = vpack.c.bf16 %v403_v7, %v402_v5 }
  0x99   :  { %1974 = vmatpush3.bf16.msra.mxu0 %v1973_v28  ;;  %v2025_v28 = vpack.c.bf16 %v363_v20, %v362_v19  ;;  %v405_v19 = vld [vmem:[%s3329_s1 + $0xb78] sm:$0xff] }
  0x9a   :  { %1976 = vmatprep.subr.bf16.mxu0 %v1975_v30  ;;  %v2027_v30 = vpack.c.bf16 %v381_v25, %v380_v24  ;;  %v1274_v25 = vld [vmem:[%s3331_s2] ss:$0 sm:$0xff] }
  0x9b   :  { %2006 = vmatpush3.bf16.msra.mxu1 %v2005_v29  ;;  %v2057_v29 = vpack.c.bf16 %v395_v23, %v394_v21  ;;  %v36_v23 = vld [vmem:[%s3330_s0 + $0xb0] sm:$0xff] }
  0x9c   :  { %2008 = vmatprep.subr.bf16.mxu1 %v2007_v34  ;;  %v2059_v34 = vpack.c.bf16 %v413_v27, %v412_v26 }
  0x9d   :  { %1978 = vmatpush3.bf16.msra.mxu0 %v1977_v40  ;;  %v2029_v40 = vpack.c.bf16 %v365_v32, %v364_v31 }
  0x9e   :  { %1980 = vmatprep.subr.bf16.mxu0 %v1979_v42  ;;  %v2031_v42 = vpack.c.bf16 %v383_v37, %v382_v36 }
  0x9f   :  { %2010 = vmatpush3.bf16.msra.mxu1 %v2009_v41  ;;  %v2061_v41 = vpack.c.bf16 %v397_v35, %v396_v33 }
  0xa0   :  { %2012 = vmatprep.subr.bf16.mxu1 %v2011_v46  ;;  %v2063_v46 = vpack.c.bf16 %v415_v39, %v414_v38 }
  0xa1   :  { %1982 = vmatpush3.bf16.msra.mxu0 %v1981_v52  ;;  %v2033_v52 = vpack.c.bf16 %v367_v44, %v366_v43 }
  0xa2   :  { %2016 = vmatprep.subr.bf16.mxu0 %v2015_v54  ;;  %v2035_v54 = vpack.c.bf16 %v385_v49, %v384_v48 }
  0xa3   :  { %2014 = vmatpush3.bf16.msra.mxu1 %v2013_v53  ;;  %v2065_v53 = vpack.c.bf16 %v399_v47, %v398_v45 }
  0xa4   :  { %2048 = vmatprep.subr.bf16.mxu1 %v2047_v58  ;;  %1054 = vmatmul.mubr.f32.vlgmr.msra.gmra.mrb[8].mxu0 %v30_v0  ;;  %v2067_v58 = vpack.c.bf16 %v417_v51, %v416_v50  ;;  %v2037_v0 = vpack.c.bf16 %v369_v56, %v368_v55 }
  0xa5   :  { %2018 = vmatpush3.bf16.msra.mxu0 %v2017_v1  ;;  %1193 = vmatprep.mubr.f32.mxu0 %v35_v14  ;;  %v2069_v1 = vpack.c.bf16 %v401_v59, %v400_v57 }
  0xa6   :  { %1124 = vmatmul.mubr.f32.vlgmr.msra.gmra.mrb[8].mxu1 %v32_v2  ;;  %2020 = vmatprep.subr.bf16.mxu0 %v2019_v4  ;;  %v2039_v2 = vpack.c.bf16 %v387_v61, %v386_v60  ;;  %v371_v4 = vld [vmem:[%s3329_s1 + $0xa68] sm:$0xff] }
  0xa7   :  { %2050 = vmatpush3.bf16.msra.mxu1 %v2049_v3  ;;  %1263 = vmatprep.mubr.f32.mxu1 %v37_v16  ;;  %v370_v3 = vld [vmem:[%s3329_s1 + $0xa60] sm:$0xff]  ;;  %v373_v16 = vld [vmem:[%s3329_s1 + $0xa78] sm:$0xff] }
  0xa8   :  { %2052 = vmatprep.subr.bf16.mxu1 %v2051_v8  ;;  %v388_v8 = vld [vmem:[%s3329_s1 + $0xaf0] sm:$0xff]  ;;  %v2041_v12 = vpack.c.bf16 %v371_v4, %v370_v3 }
  0xa9   :  { %2022 = vmatpush3.bf16.msra.mxu0 %v2021_v15  ;;  %v2043_v14 = vpack.c.bf16 %v389_v9, %v388_v8  ;;  %v372_v15 = vld [vmem:[%s3329_s1 + $0xa70] sm:$0xff] }
  0xaa   :  { %2024 = vmatprep.subr.bf16.mxu0 %v2023_v18  ;;  %v404_v18 = vld [vmem:[%s3329_s1 + $0xb70] sm:$0xff]  ;;  %v2045_v20 = vpack.c.bf16 %v373_v16, %v372_v15 }
  0xab   :  { %2054 = vmatpush3.bf16.msra.mxu1 %v2053_v17  ;;  %v2075_v17 = vpack.c.bf16 %v421_v11, %v420_v10  ;;  %v2077_v21 = vpack.c.bf16 %v405_v19, %v404_v18 }
  0xac   :  { %2056 = vmatprep.subr.bf16.mxu1 %v2055_v22  ;;  %v34_v22 = vld [vmem:[%s3330_s0 + $0xa0] sm:$0xff] }
  0xad   :  { %2026 = vmatpush3.bf16.msra.mxu0 %v2025_v28 }
  0xae   :  { %2028 = vmatprep.subr.bf16.mxu0 %v2027_v30 }
  0xaf   :  { %2058 = vmatpush3.bf16.msra.mxu1 %v2057_v29 }
  0xb0   :  { %2060 = vmatprep.subr.bf16.mxu1 %v2059_v34 }
  0xb1   :  { %2030 = vmatpush3.bf16.msra.mxu0 %v2029_v40 }
  0xb2   :  { %2032 = vmatprep.subr.bf16.mxu0 %v2031_v42 }
  0xb3   :  { %2062 = vmatpush3.bf16.msra.mxu1 %v2061_v41 }
  0xb4   :  { %2064 = vmatprep.subr.bf16.mxu1 %v2063_v46 }
  0xb5   :  { %2034 = vmatpush3.bf16.msra.mxu0 %v2033_v52 }
  0xb6   :  { %2036 = vmatprep.subr.bf16.mxu0 %v2035_v54 }
  0xb7   :  { %2066 = vmatpush3.bf16.msra.mxu1 %v2065_v53 }
  0xb8   :  { %2068 = vmatprep.subr.bf16.mxu1 %v2067_v58 }
  0xb9   :  { %2038 = vmatpush3.bf16.msra.mxu0 %v2037_v0 }
  0xba   :  { %2040 = vmatprep.subr.bf16.mxu0 %v2039_v2 }
  0xbb   :  { %2070 = vmatpush3.bf16.msra.mxu1 %v2069_v1 }
  0xbc   :  { %2072 = vmatprep.subr.bf16.mxu1 %v2071_v6 }
  0xbd   :  { %2042 = vmatpush3.bf16.msra.mxu0 %v2041_v12 }
  0xbe   :  { %2044 = vmatprep.subr.bf16.mxu0 %v2043_v14 }
  0xbf   :  { %2074 = vmatpush3.bf16.msra.mxu1 %v2073_v13 }
  0xc0   :  { %2076 = vmatprep.subr.bf16.mxu1 %v2075_v17 }
  0xc1   :  { %2046 = vmatpush3.bf16.msra.mxu0 %v2045_v20 }
  0xc3   :  { %2078 = vmatpush3.bf16.msra.mxu1 %v2077_v21 }
  0xc4   :  { %1194 = vmatmul.mubr.f32.vlgmr.msra.gmra.mrb[10].mxu0 %v34_v22 }
  0xc6   :  { %1264 = vmatmul.mubr.f32.vlgmr.msra.gmra.mrb[10].mxu1 %v36_v23 }
  0xf7   :  { %v1307_v24 = vpop.f32.mrb[0].mxu0 }
  0xf8   :  { %v1308_v26 = vpop.f32.mrb[1].mxu0 }
  0xf9   :  { %v1342_v27 = vpop.f32.mrb[0].mxu1  ;;  %v1309_v28 = vadd.f32 %v1308_v26, %v1307_v24 }
  0xfa   :  { %v1343_v29 = vpop.f32.mrb[1].mxu1 }
  0xfb   :  { %v1344_v30 = vadd.f32 %v1343_v29, %v1342_v27  ;;  %v496_v31 = vadd.f32 %v1309_v28, %v1274_v25 }
  0xfd   :  { %v566_v32 = vadd.f32 %v1344_v30, %v496_v31 }
 0x117   :  { %v1377_v33 = vpop.f32.mrb[2].mxu0 }
 0x118   :  { %v1378_v34 = vpop.f32.mrb[3].mxu0 }
 0x119   :  { %v1412_v35 = vpop.f32.mrb[2].mxu1  ;;  %v1379_v36 = vadd.f32 %v1378_v34, %v1377_v33 }
 0x11a   :  { %v1413_v37 = vpop.f32.mrb[3].mxu1 }
 0x11b   :  { %v1414_v38 = vadd.f32 %v1413_v37, %v1412_v35  ;;  %v636_v39 = vadd.f32 %v1379_v36, %v566_v32 }
 0x11d   :  { %v706_v40 = vadd.f32 %v1414_v38, %v636_v39 }
 0x137   :  { %v1447_v41 = vpop.f32.mrb[4].mxu0 }
 0x138   :  { %v1448_v42 = vpop.f32.mrb[5].mxu0 }
 0x139   :  { %v1482_v43 = vpop.f32.mrb[4].mxu1  ;;  %v1449_v44 = vadd.f32 %v1448_v42, %v1447_v41 }
 0x13a   :  { %v1483_v45 = vpop.f32.mrb[5].mxu1 }
 0x13b   :  { %v1484_v46 = vadd.f32 %v1483_v45, %v1482_v43  ;;  %v776_v47 = vadd.f32 %v1449_v44, %v706_v40 }
 0x13d   :  { %v846_v48 = vadd.f32 %v1484_v46, %v776_v47 }
 0x157   :  { %v1517_v49 = vpop.f32.mrb[6].mxu0 }
 0x158   :  { %v1518_v50 = vpop.f32.mrb[7].mxu0 }
 0x159   :  { %v1552_v51 = vpop.f32.mrb[6].mxu1  ;;  %v1519_v52 = vadd.f32 %v1518_v50, %v1517_v49 }
 0x15a   :  { %v1553_v53 = vpop.f32.mrb[7].mxu1 }
 0x15b   :  { %v1554_v54 = vadd.f32 %v1553_v53, %v1552_v51  ;;  %v916_v55 = vadd.f32 %v1519_v52, %v846_v48 }
 0x15d   :  { %v986_v56 = vadd.f32 %v1554_v54, %v916_v55 }
 0x177   :  { %v1587_v57 = vpop.f32.mrb[8].mxu0 }
 0x178   :  { %v1588_v58 = vpop.f32.mrb[9].mxu0 }
 0x179   :  { %v1622_v59 = vpop.f32.mrb[8].mxu1  ;;  %v1589_v60 = vadd.f32 %v1588_v58, %v1587_v57 }
 0x17a   :  { %v1623_v61 = vpop.f32.mrb[9].mxu1 }
 0x17b   :  { %v1624_v62 = vadd.f32 %v1623_v61, %v1622_v59  ;;  %v1056_v63 = vadd.f32 %v1589_v60, %v986_v56 }
 0x17d   :  { %v1126_v0 = vadd.f32 %v1624_v62, %v1056_v63 }
 0x197   :  { %v1657_v1 = vpop.f32.mrb[10].mxu0 }
 0x198   :  { %v1658_v2 = vpop.f32.mrb[11].mxu0 }
 0x199   :  { %v1692_v3 = vpop.f32.mrb[10].mxu1  ;;  %v1659_v4 = vadd.f32 %v1658_v2, %v1657_v1 }
 0x19a   :  { %v1693_v5 = vpop.f32.mrb[11].mxu1 }
 0x19b   :  { %v1694_v6 = vadd.f32 %v1693_v5, %v1692_v3  ;;  %v1196_v7 = vadd.f32 %v1659_v4, %v1126_v0 }
 0x19d   :  { %v1266_v8 = vadd.f32 %v1694_v6, %v1196_v7 }
 0x19f   :  { %1269 = vst [vmem:[%s3332_s3] sm:$0xff] %v1266_v8 }

</bundles_post_ra>
